<compile_context>
chip_gen: v7x
topology: tpu7x:2x2x1
jax: 0.10.0
libtpu: 0.0.40
codegen_flags: <defaults>
</compile_context>

<pallas_src>
import functools

import jax
import jax.numpy as jnp
from jax.experimental import pallas as pl
from jax.experimental.pallas import tpu as pltpu


def _round_up(x, m):
    return ((x + m - 1) // m) * m


def _mlp_mean_kernel(n_linear, *refs):
    """Computes one (TB, ac_dim) tile of mean = mean_net(obs).

    refs layout: obs_ref, (w0, b0), ..., (w_{n_linear-1}, b_{n_linear-1}), mean_ref
    Weights are bf16 (prepared once); biases f32; obs f32 (cast to bf16 in vregs).
    """
    obs_ref = refs[0]
    w_refs = refs[1 : 1 + 2 * n_linear : 2]
    b_refs = refs[2 : 2 + 2 * n_linear : 2]
    mean_ref = refs[1 + 2 * n_linear]

    x = obs_ref[...].astype(jnp.bfloat16)  # (TB, ob_dim), cheap VPU cast
    for i in range(n_linear):
        # bf16 x bf16 -> f32 MXU matmul; Mosaic pads the tiny feature dims in vregs.
        h = jnp.dot(x, w_refs[i][...], preferred_element_type=jnp.float32)
        h = h + b_refs[i][...]  # f32 bias add (VPU)
        if i < n_linear - 1:
            h = jnp.tanh(h)  # f32 tanh on EUP (otherwise-idle slot)
            x = h.astype(jnp.bfloat16)
        else:
            x = h  # output layer: identity activation (ptu.build_mlp default)
    mean_ref[...] = x.astype(mean_ref.dtype)


def prepare_params(weights, biases):
    """One-time parameter prep (hoisted out of the per-call path).

    weights: list of (in, out) f32 -> bf16 (MXU operands)
    biases:  list of (out,) or (1, out) f32 -> (1, out) f32
    """
    ws = [jnp.asarray(w, jnp.bfloat16) for w in weights]
    bs = [jnp.asarray(b, jnp.float32).reshape(1, -1) for b in biases]
    return ws, bs


def mlp_policy_forward(obs, weights_bf16, biases, logstd, *, tile_b=256):
    """MLP policy forward: returns (mean, std) of the Normal action distribution.

    obs:          (B, ob_dim) float32
    weights_bf16: list of (in, out) bfloat16 matrices (from prepare_params)
    biases:       list of (1, out) float32 row vectors (from prepare_params)
    logstd:       (ac_dim,) or (1, ac_dim) float32

    Returns (mean: (B, ac_dim) f32, std: (1, ac_dim) f32).
    """
    B, ob_dim = obs.shape
    ac_dim = weights_bf16[-1].shape[1]
    n_linear = len(weights_bf16)

    # Batch tile: multiple of 8 sublanes; batch padded only to the 8-row boundary.
    TB = max(8, _round_up(min(tile_b, _round_up(B, 8)), 8))
    B_pad = _round_up(B, 8)
    obs_p = obs if B_pad == B else jnp.pad(obs, ((0, B_pad - B), (0, 0)))

    grid = (pl.cdiv(B_pad, TB),)  # partial last tile handled via masked block writes

    # Streamed obs tiles (feature dim == full array dim, so no lane padding in HBM).
    in_specs = [pl.BlockSpec((TB, ob_dim), lambda i: (i, 0))]
    for w, b in zip(weights_bf16, biases):
        # Constant index_map -> parameters stay VMEM-resident across all grid steps.
        in_specs.append(pl.BlockSpec(w.shape, lambda i: (0, 0)))
        in_specs.append(pl.BlockSpec(b.shape, lambda i: (0, 0)))
    out_spec = pl.BlockSpec((TB, ac_dim), lambda i: (i, 0))

    flat_params = []
    for w, b in zip(weights_bf16, biases):
        flat_params.append(w)
        flat_params.append(b)

    kernel = functools.partial(_mlp_mean_kernel, n_linear)

    mean_pad = pl.pallas_call(
        kernel,
        out_shape=jax.ShapeDtypeStruct((B_pad, ac_dim), jnp.float32),
        grid=grid,
        in_specs=in_specs,
        out_specs=out_spec,
        compiler_params=pltpu.CompilerParams(dimension_semantics=("parallel",)),
    )(obs_p, *flat_params)

    mean = mean_pad if B_pad == B else mean_pad[:B]
    # std = exp(logstd): tiny (1, ac_dim) op; the Normal distribution only needs the
    # per-dim scale, so we do NOT materialize a (B, ac_dim) broadcast.
    std = jnp.exp(jnp.asarray(logstd, jnp.float32).reshape(1, -1))
    return mean, std


def build_params(key, ob_dim, ac_dim, n_layers, size):
    """Deterministic synthetic parameters matching ptu.build_mlp shapes."""
    dims = [ob_dim] + [size] * n_layers + [ac_dim]
    weights, biases = [], []
    for i in range(len(dims) - 1):
        key, kw, kb = jax.random.split(key, 3)
        fan_in = dims[i]
        bound = 1.0 / jnp.sqrt(fan_in)
        w = jax.random.uniform(kw, (dims[i], dims[i + 1]), jnp.float32, -bound, bound)
        b = jax.random.uniform(kb, (1, dims[i + 1]), jnp.float32, -bound, bound)
        weights.append(w)
        biases.append(b)
    # nn.Parameter(torch.zeros(ac_dim)) -> logstd initialized to zeros
    logstd = jnp.zeros((1, ac_dim), jnp.float32)
    return weights, biases, logstd


def reference_forward(obs, weights, biases, logstd):
    """Pure-f32 JAX reference (kernel uses bf16 matmul operands -> compare loosely)."""
    x = obs
    for i, (w, b) in enumerate(zip(weights, biases)):
        x = x @ w + b
        if i < len(weights) - 1:
            x = jnp.tanh(x)
    mean = x
    std = jnp.exp(jnp.asarray(logstd, jnp.float32).reshape(1, -1))
    return mean, std


if __name__ == "__main__":
    # Small shapes consistent with the module's __init__ / forward.
    B, ob_dim, ac_dim, n_layers, size = 8, 16, 4, 2, 32

    key = jax.random.PRNGKey(0)
    key, k_obs = jax.random.split(key)
    obs = jax.random.normal(k_obs, (B, ob_dim), jnp.float32)

    weights, biases, logstd = build_params(key, ob_dim, ac_dim, n_layers, size)
    # One-time parameter prep (bf16 weight cast hoisted out of the per-call path).
    weights_bf16, biases_p = prepare_params(weights, biases)

    # Whole forward under a single jit (tile_b is static).
    forward = jax.jit(mlp_policy_forward, static_argnames=("tile_b",))

    mean, std = forward(obs, weights_bf16, biases_p, logstd)
    jax.block_until_ready((mean, std))

    mean_ref, std_ref = reference_forward(obs, weights, biases, logstd)
    assert mean.shape == (B, ac_dim) and std.shape == (1, ac_dim)
    # bf16 matmul operands -> ~1e-3-level deviation from the true-f32 reference.
    assert jnp.allclose(mean, mean_ref, atol=2e-2, rtol=2e-2)
    assert jnp.allclose(std, std_ref, atol=1e-6, rtol=1e-6)

    # Batch that actually tiles: multiple grid steps, non-multiple of TB (partial tile).
    B2 = 2000
    key, k2 = jax.random.split(key)
    obs2 = jax.random.normal(k2, (B2, ob_dim), jnp.float32)
    mean2, std2 = forward(obs2, weights_bf16, biases_p, logstd)
    jax.block_until_ready((mean2, std2))
    mean2_ref, _ = reference_forward(obs2, weights, biases, logstd)
    assert mean2.shape == (B2, ac_dim)
    assert jnp.allclose(mean2, mean2_ref, atol=2e-2, rtol=2e-2)

    # Batch that is not a multiple of 8 (exercises the 8-row pad + partial last tile).
    B3 = 1025
    key, k3 = jax.random.split(key)
    obs3 = jax.random.normal(k3, (B3, ob_dim), jnp.float32)
    mean3, _ = forward(obs3, weights_bf16, biases_p, logstd)
    jax.block_until_ready(mean3)
    mean3_ref, _ = reference_forward(obs3, weights, biases, logstd)
    assert mean3.shape == (B3, ac_dim)
    assert jnp.allclose(mean3, mean3_ref, atol=2e-2, rtol=2e-2)

    # TODO(synk): Normal(mean, std).sample() / Categorical sampling is stochastic
    # distribution logic, not a tensor hot path; we return (mean, std) instead.
    print("KERNEL_OK")
</pallas_src>

<mosaic_0001>
module attributes {stable_mosaic.version = 11 : i64} {
  func.func @_mlp_mean_kernel(%arg0: i32, %arg1: memref<8x16xf32, #tpu.memory_space<vmem>>, %arg2: memref<16x32xbf16, #tpu.memory_space<vmem>>, %arg3: memref<1x32xf32, #tpu.memory_space<vmem>>, %arg4: memref<32x32xbf16, #tpu.memory_space<vmem>>, %arg5: memref<1x32xf32, #tpu.memory_space<vmem>>, %arg6: memref<32x4xbf16, #tpu.memory_space<vmem>>, %arg7: memref<1x4xf32, #tpu.memory_space<vmem>>, %arg8: memref<8x4xf32, #tpu.memory_space<vmem>>) attributes {dimension_semantics = [#tpu.dimension_semantics<parallel>], iteration_bounds = array<i64: 1>, scalar_prefetch = 0 : i64, scratch_operands = 0 : i64, tpu.core_type = #tpu.core_type<tc>, window_params = [{transform_indices = @transform_0, window_bounds = array<i64: 8, 16>}, {pipeline_mode = #tpu.pipeline_mode<synchronous>, transform_indices = @transform_1, window_bounds = array<i64: 16, 32>}, {pipeline_mode = #tpu.pipeline_mode<synchronous>, transform_indices = @transform_2, window_bounds = array<i64: 1, 32>}, {pipeline_mode = #tpu.pipeline_mode<synchronous>, transform_indices = @transform_3, window_bounds = array<i64: 32, 32>}, {pipeline_mode = #tpu.pipeline_mode<synchronous>, transform_indices = @transform_4, window_bounds = array<i64: 1, 32>}, {pipeline_mode = #tpu.pipeline_mode<synchronous>, transform_indices = @transform_5, window_bounds = array<i64: 32, 4>}, {pipeline_mode = #tpu.pipeline_mode<synchronous>, transform_indices = @transform_6, window_bounds = array<i64: 1, 4>}, {transform_indices = @transform_7, window_bounds = array<i64: 8, 4>}]} {
    %c0 = arith.constant 0 : index
    %c0_0 = arith.constant 0 : index
    %0 = vector.load %arg1[%c0, %c0_0] : memref<8x16xf32, #tpu.memory_space<vmem>>, vector<8x16xf32>
    %1 = arith.truncf %0 : vector<8x16xf32> to vector<8x16xbf16>
    %c0_1 = arith.constant 0 : index
    %c0_2 = arith.constant 0 : index
    %2 = vector.load %arg2[%c0_1, %c0_2] : memref<16x32xbf16, #tpu.memory_space<vmem>>, vector<16x32xbf16>
    %cst = arith.constant dense<0.000000e+00> : vector<8x32xf32>
    %3 = tpu.matmul %1, %2, %cst {dimension_numbers = #tpu.dot_dimension_numbers<[1], [0], [0], [1], [0, 0, 1, 1], [], []>} : vector<8x16xbf16>, vector<16x32xbf16>, vector<8x32xf32> -> vector<8x32xf32>
    %c0_3 = arith.constant 0 : index
    %c0_4 = arith.constant 0 : index
    %4 = vector.load %arg3[%c0_3, %c0_4] : memref<1x32xf32, #tpu.memory_space<vmem>>, vector<1x32xf32>
    %5 = vector.broadcast %4 : vector<1x32xf32> to vector<8x32xf32>
    %6 = arith.addf %3, %5 : vector<8x32xf32>
    %7 = math.tanh %6 : vector<8x32xf32>
    %8 = arith.truncf %7 : vector<8x32xf32> to vector<8x32xbf16>
    %c0_5 = arith.constant 0 : index
    %c0_6 = arith.constant 0 : index
    %9 = vector.load %arg4[%c0_5, %c0_6] : memref<32x32xbf16, #tpu.memory_space<vmem>>, vector<32x32xbf16>
    %cst_7 = arith.constant dense<0.000000e+00> : vector<8x32xf32>
    %10 = tpu.matmul %8, %9, %cst_7 {dimension_numbers = #tpu.dot_dimension_numbers<[1], [0], [0], [1], [0, 0, 1, 1], [], []>} : vector<8x32xbf16>, vector<32x32xbf16>, vector<8x32xf32> -> vector<8x32xf32>
    %c0_8 = arith.constant 0 : index
    %c0_9 = arith.constant 0 : index
    %11 = vector.load %arg5[%c0_8, %c0_9] : memref<1x32xf32, #tpu.memory_space<vmem>>, vector<1x32xf32>
    %12 = vector.broadcast %11 : vector<1x32xf32> to vector<8x32xf32>
    %13 = arith.addf %10, %12 : vector<8x32xf32>
    %14 = math.tanh %13 : vector<8x32xf32>
    %15 = arith.truncf %14 : vector<8x32xf32> to vector<8x32xbf16>
    %c0_10 = arith.constant 0 : index
    %c0_11 = arith.constant 0 : index
    %16 = vector.load %arg6[%c0_10, %c0_11] : memref<32x4xbf16, #tpu.memory_space<vmem>>, vector<32x4xbf16>
    %cst_12 = arith.constant dense<0.000000e+00> : vector<8x4xf32>
    %17 = tpu.matmul %15, %16, %cst_12 {dimension_numbers = #tpu.dot_dimension_numbers<[1], [0], [0], [1], [0, 0, 1, 1], [], []>} : vector<8x32xbf16>, vector<32x4xbf16>, vector<8x4xf32> -> vector<8x4xf32>
    %c0_13 = arith.constant 0 : index
    %c0_14 = arith.constant 0 : index
    %18 = vector.load %arg7[%c0_13, %c0_14] : memref<1x4xf32, #tpu.memory_space<vmem>>, vector<1x4xf32>
    %19 = vector.broadcast %18 : vector<1x4xf32> to vector<8x4xf32>
    %20 = arith.addf %17, %19 : vector<8x4xf32>
    %c0_15 = arith.constant 0 : index
    %c0_16 = arith.constant 0 : index
    %21 = vector.load %arg8[%c0_15, %c0_16] : memref<8x4xf32, #tpu.memory_space<vmem>>, vector<8x4xf32>
    tpu.vector_store %arg8[%c0_15, %c0_16], %20 {strides = array<i32>} : memref<8x4xf32, #tpu.memory_space<vmem>>, vector<8x4xf32>,
    return
  }
  func.func @transform_0(%arg0: i32) -> (i32, i32) {
    %c0_i32 = arith.constant 0 : i32
    %c0_i32_0 = arith.constant 0 : i32
    return %arg0, %c0_i32 : i32, i32
  }
  func.func @transform_1(%arg0: i32) -> (i32, i32) {
    %c0_i32 = arith.constant 0 : i32
    %c0_i32_0 = arith.constant 0 : i32
    %c0_i32_1 = arith.constant 0 : i32
    return %c0_i32, %c0_i32_0 : i32, i32
  }
  func.func @transform_2(%arg0: i32) -> (i32, i32) {
    %c0_i32 = arith.constant 0 : i32
    %c0_i32_0 = arith.constant 0 : i32
    %c0_i32_1 = arith.constant 0 : i32
    return %c0_i32, %c0_i32_0 : i32, i32
  }
  func.func @transform_3(%arg0: i32) -> (i32, i32) {
    %c0_i32 = arith.constant 0 : i32
    %c0_i32_0 = arith.constant 0 : i32
    %c0_i32_1 = arith.constant 0 : i32
    return %c0_i32, %c0_i32_0 : i32, i32
  }
  func.func @transform_4(%arg0: i32) -> (i32, i32) {
    %c0_i32 = arith.constant 0 : i32
    %c0_i32_0 = arith.constant 0 : i32
    %c0_i32_1 = arith.constant 0 : i32
    return %c0_i32, %c0_i32_0 : i32, i32
  }
  func.func @transform_5(%arg0: i32) -> (i32, i32) {
    %c0_i32 = arith.constant 0 : i32
    %c0_i32_0 = arith.constant 0 : i32
    %c0_i32_1 = arith.constant 0 : i32
    return %c0_i32, %c0_i32_0 : i32, i32
  }
  func.func @transform_6(%arg0: i32) -> (i32, i32) {
    %c0_i32 = arith.constant 0 : i32
    %c0_i32_0 = arith.constant 0 : i32
    %c0_i32_1 = arith.constant 0 : i32
    return %c0_i32, %c0_i32_0 : i32, i32
  }
  func.func @transform_7(%arg0: i32) -> (i32, i32) {
    %c0_i32 = arith.constant 0 : i32
    %c0_i32_0 = arith.constant 0 : i32
    return %arg0, %c0_i32 : i32, i32
  }
}

</mosaic_0001>

<bundles_post_ra>
// kernel: mlp_policy_forward.1
= control target key start
LH: loop header
LB: loop body
LE: loop exit
PB: predicated region body
PF: predicated region fallthrough
CT: control target
= control target key end

     0   :  { %12 = vsyncpa [#allocation3], 0  ;;  %s325_s24 = smov [#allocation2]   ;;  %s411_s0 = inlined_call_operand.vmem [shape: f32[8,16], index: 0, kind: input, shape index: {}]   ;;  %s412_s1 = inlined_call_operand.hbm [shape: bf16[16,32], index: 1, kind: input, shape index: {}]   ;;  %s413_s2 = inlined_call_operand.vmem [shape: f32[1,32], index: 2, kind: input, shape index: {}]   ;;  %s414_s3 = inlined_call_operand.vmem [shape: bf16[32,32], index: 3, kind: input, shape index: {}]   ;;  %s415_s4 = inlined_call_operand.vmem [shape: f32[1,32], index: 4, kind: input, shape index: {}]   ;;  %s416_s5 = inlined_call_operand.vmem [shape: bf16[32,4], index: 5, kind: input, shape index: {}]   ;;  %s417_s6 = inlined_call_operand.vmem [shape: f32[1,4], index: 6, kind: input, shape index: {}]   ;;  %s418_s7 = inlined_call_operand.vmem [shape: f32[8,4], index: 7, kind: output, shape index: {}]  }
   0x1   :  { %s20_s25 = sshll.u32 %s325_s24, 4  ;;  %s301_s28 = scalar_lea.hbm %s412_s1, 128  ;;  %s21_s25 = int_to_ptr.vmem [resolvable:$true] %s20_s25 }
   0x2   :  { %p302_p0 = scmp.ne.s32.totalorder %s412_s1, %s301_s28  ;;  %p305_p1 = scmp.lt.u32.totalorder %s301_s28, %s412_s1 }
   0x4   :  { %p307_p2 = pnand %p305_p1, %p302_p0 }
   0x6   :  { %310 = shalt.err (!%p307_p2)
}
   0x7   :  { %s311_s10 = scalar_lea.vmem %s21_s25, 128  ;;  %p316_p4 = scmp.lt.s32.totalorder %s21_s25, %s21_s25 }
   0x8   :  { %p312_p3 = scmp.ne.s32.totalorder %s21_s25, %s311_s10  ;;  %p317_p5 = scmp.lt.s32.totalorder %s311_s10, %s311_s10 }
   0xa   :  { %p318_p6 = por %p317_p5, %p316_p4 }
   0xc   :  { %p319_p7 = pnand %p318_p6, %p312_p3 }
   0xe   :  { %322 = shalt.err (!%p319_p7)
}
   0xf   :  { %s326_s11 = smov 64   ;;  %s327_s12 = smov 4  }
  0x10   :  { %26 = dma.hbm_to_vmem [thread:$0]  %s412_s1, 128, %s21_s25, [#allocation3], %s326_s11, %s326_s11, %s327_s12  }
  0x11   :  { %323 = dma.done.wait [#allocation3], 128  }
  0x12   :  { %324 = vsyncadd [#allocation3], 4294967168  ;;  %v328_v0 = vmov 0.0   ;;  %vm329_vm0 = vmmov 0   ;;  %v292_v1 = vld [vmem:[#allocation2] sm:$0xff]   ;;  %vm58_vm1 = vcmask 130048  }
  0x13   :  { %265 = vmatprep.subr.bf16.mxu0 %v328_v0  ;;  %267 = vmatprep.mubr.msk.bf16.mxu0 %vm329_vm0, %v328_v0  ;;  %v41_v2 = vld [vmem:[%s411_s0] sm:$0xff]  ;;  %v294_v5 = vld [vmem:[%s414_s3 + $0x8] sm:$0xff]   ;;  %vm127_vm2 = vcmask 261120   ;;  %vm239_vm3 = vcmask 31744  }
  0x14   :  { %271 = vmatprep.subr.bf16.mxu1 %v328_v0  ;;  %275 = vmatprep.mubr.msk.bf16.mxu1 %vm329_vm0, %v328_v0  ;;  %v42_v3 = vpack.c.bf16 %v41_v2, %v41_v2  ;;  %v293_v4 = vld [vmem:[%s414_s3] sm:$0xff]   ;;  %v296_v15 = vld [vmem:[%s416_s5 + $0x8] sm:$0xff]  }
  0x15   :  { %266 = vmatpush3.bf16.msra.mxu0 %v292_v1  ;;  %272 = vmatpush3.bf16.msra.mxu1 %v293_v4  ;;  %v246_v6 = vld [vmem:[%s413_s2] ss:$0 sm:$0xff] }
  0x16   :  { %279 = vmatprep.subr.bf16.mxu0 %v328_v0  ;;  %273 = vmatprep.subr.bf16.mxu1 %v328_v0  ;;  %v295_v14 = vld [vmem:[%s416_s5] sm:$0xff]  }
  0x17   :  { %v249_v16 = vld [vmem:[%s415_s4] ss:$0 sm:$0xff] }
  0x18   :  { %268 = vmatmul.mubr.msk.bf16.vlgmr.msra.gmra.mrb[0].mxu0 %vm58_vm1, %v42_v3  ;;  %v253_v24 = vld [vmem:[%s417_s6] ss:$0 sm:$0xff] }
  0x19   :  { %283 = vmatprep.mubr.msk.bf16.mxu0 %vm329_vm0, %v328_v0  ;;  %274 = vmatpush3.bf16.msra.mxu1 %v294_v5 }
  0x1a   :  { %280 = vmatpush3.bf16.msra.mxu0 %v295_v14 }
  0x1b   :  { %281 = vmatprep.subr.bf16.mxu0 %v328_v0 }
  0x1e   :  { %282 = vmatpush3.bf16.msra.mxu0 %v296_v15 }
  0xeb   :  { %v96_v7 = vpop.f32.mrb[0].mxu0 }
  0xec   :  { %v97_v8 = vadd.f32 %v246_v6, %v96_v7  ;;  %v269_v9 = vpop.f32.mrb[1].mxu0 }
  0xed   :  { %v99_v10 = vpop.f32.mrb[2].mxu0 }
  0xee   :  { %297 = vtanh.f32 %v97_v8  ;;  %v270_v11 = vpop.f32.mrb[3].mxu0 }
  0xf8   :  { %v298_v12 = vpop.eup %297 }
  0xf9   :  { %v103_v13 = vpack.c.bf16 %v298_v12, %v298_v12 }
  0xfb   :  { %276 = vmatmul.mubr.msk.bf16.vlgmr.msra.gmra.mrb[0].mxu1 %vm127_vm2, %v103_v13 }
 0x1ce   :  { %v165_v17 = vpop.f32.mrb[0].mxu1 }
 0x1cf   :  { %v166_v18 = vadd.f32 %v249_v16, %v165_v17  ;;  %v277_v19 = vpop.f32.mrb[1].mxu1 }
 0x1d0   :  { %v168_v20 = vpop.f32.mrb[2].mxu1 }
 0x1d1   :  { %299 = vtanh.f32 %v166_v18  ;;  %v278_v21 = vpop.f32.mrb[3].mxu1 }
 0x1db   :  { %v300_v22 = vpop.eup %299 }
 0x1dc   :  { %v172_v23 = vpack.c.bf16 %v300_v22, %v300_v22 }
 0x1de   :  { %284 = vmatmul.mubr.msk.bf16.vlgmr.msra.gmra.mrb[4].mxu0 %vm127_vm2, %v172_v23 }
 0x2b1   :  { %v233_v25 = vpop.f32.mrb[4].mxu0 }
 0x2b2   :  { %v234_v26 = vadd.f32 %v253_v24, %v233_v25  ;;  %v285_v27 = vpop.f32.mrb[5].mxu0 }
 0x2b3   :  { %v236_v28 = vpop.f32.mrb[6].mxu0 }
 0x2b4   :  { %240 = vst.msk [vmem:[%s418_s7] sm:$0xff] %vm239_vm3, %v234_v26  ;;  %v286_v29 = vpop.f32.mrb[7].mxu0 }
 0x2b5   :  { %245 = vsyncpa [#allocation3], 1 }

</bundles_post_ra>
